<compile_context>
chip_gen: v5e
topology: v5e:2x2
jax: 0.10.0
libtpu: 0.0.40
codegen_flags: <defaults>
</compile_context>

<pallas_src>
import numpy as np
import jax
import jax.numpy as jnp
from jax.experimental import pallas as pl
from jax.experimental.pallas import tpu as pltpu


def lstm_step_kernel(xh_ref, c_ref, w_ref, b_ref, wlin_ref, blin_ref,
                     o_ref, h_out_ref, c_out_ref):
    """One fused LSTM cell step + linear head. Everything resident in VMEM."""
    xh = xh_ref[...]            # (B, I+H)  -- [x, h] concatenated on the lane axis
    c = c_ref[...]              # (B, H)

    H = c.shape[1]

    # Single fused MXU matmul for all four gates: (B, I+H) @ (I+H, 4H) + (1, 4H)
    gates = (jnp.dot(xh, w_ref[...], preferred_element_type=jnp.float32)
             + b_ref[...])      # (B, 4H)

    # One whole-vreg tanh on the EUP; sigmoid lanes recovered via
    # sigmoid(x) = 0.5 * tanh(x / 2) + 0.5 (exact identity).
    lane = jax.lax.broadcasted_iota(jnp.int32, gates.shape, 1)
    is_cell_gate = (lane >= 2 * H) & (lane < 3 * H)        # 'g' block (tanh lanes)
    pre = jnp.where(is_cell_gate, gates, 0.5 * gates)      # VPU pre-scale
    t = jnp.tanh(pre)                                      # EUP, full (B, 4H) tile
    act = jnp.where(is_cell_gate, t, 0.5 * t + 0.5)        # VPU fixup/select

    # Cheap VPU combine on per-gate slices (gate order: i, f, g, o).
    i_g = act[:, 0 * H:1 * H]
    f_g = act[:, 1 * H:2 * H]
    g_g = act[:, 2 * H:3 * H]
    o_g = act[:, 3 * H:4 * H]

    c_new = f_g * c + i_g * g_g
    h_new = o_g * jnp.tanh(c_new)

    # State outputs are (1, B, H) -- leading singleton keeps the same
    # sublane/lane layout, so this is a plain store.
    c_out_ref[0] = c_new
    h_out_ref[0] = h_new
    # Linear head: (B, O)
    o_ref[...] = (jnp.dot(h_new, wlin_ref[...],
                          preferred_element_type=jnp.float32)
                  + blin_ref[...])


def _vmem_spec():
    return pl.BlockSpec(memory_space=pltpu.VMEM)


def prepare_params(w_ih, w_hh, b_ih, b_hh, w_lin, b_lin):
    """One-time preprocessing: fuse + transpose weights so the per-call path
    contains no XLA transposes/adds/casts."""
    H = w_hh.shape[1]
    O = w_lin.shape[0]
    # Fused gate weight: [x, h] @ w_fused == x @ W_ih^T + h @ W_hh^T
    w_fused = jnp.concatenate(
        [jnp.asarray(w_ih.T, jnp.float32),      # (I, 4H)
         jnp.asarray(w_hh.T, jnp.float32)],     # (H, 4H)
        axis=0)                                 # (I+H, 4H)
    b_fused = (b_ih + b_hh).reshape(1, 4 * H).astype(jnp.float32)
    wlin_t = jnp.asarray(w_lin.T, jnp.float32)  # (H, O)
    blin = b_lin.reshape(1, O).astype(jnp.float32)
    return w_fused, b_fused, wlin_t, blin


@jax.jit
def lstm_forward(x, h, c, w_fused, b_fused, wlin_t, blin):
    """x: (B, I); h, c: (1, B, H). Returns (o, (h', c')) mirroring the module."""
    B, I = x.shape
    H, O = wlin_t.shape

    h2 = h.reshape(B, H).astype(jnp.float32)
    c2 = c.reshape(B, H).astype(jnp.float32)
    # Tiny lane-axis concat so the kernel runs a single fused gate matmul.
    xh = jnp.concatenate([x.astype(jnp.float32), h2], axis=1)   # (B, I+H)

    cost = pl.CostEstimate(
        flops=2 * B * (I + H) * 4 * H + 2 * B * H * O,
        transcendentals=5 * B * H,                 # one tanh over 4H + tanh over H
        bytes_accessed=4 * (B * (I + H) + B * H            # xh, c
                            + (I + H) * 4 * H + 4 * H      # fused weight + bias
                            + H * O + O                    # linear head
                            + B * O + 2 * B * H),          # outputs
    )

    out_shapes = (
        jax.ShapeDtypeStruct((B, O), jnp.float32),      # o
        jax.ShapeDtypeStruct((1, B, H), jnp.float32),   # h'
        jax.ShapeDtypeStruct((1, B, H), jnp.float32),   # c'
    )
    o, h_new, c_new = pl.pallas_call(
        lstm_step_kernel,
        out_shape=out_shapes,
        in_specs=[_vmem_spec()] * 6,
        out_specs=(_vmem_spec(), _vmem_spec(), _vmem_spec()),
        cost_estimate=cost,
    )(xh, c2, w_fused, b_fused, wlin_t, blin)

    return o, (h_new, c_new)


def xavier_uniform(key, shape):
    # PyTorch xavier_uniform on a (fan_out, fan_in) 2D weight.
    fan_out, fan_in = shape
    bound = float(np.sqrt(6.0 / (fan_in + fan_out)))
    return jax.random.uniform(key, shape, jnp.float32, -bound, bound)


def init_params(key, input_size, hidden_size, output_size):
    k1, k2, k3 = jax.random.split(key, 3)
    H = hidden_size
    w_ih = xavier_uniform(k1, (4 * H, input_size))   # gate order i, f, g, o
    w_hh = xavier_uniform(k2, (4 * H, H))
    # biases: zero, forget-gate slice [H:2H] = 1.0 on BOTH biases
    b_ih = jnp.zeros((4 * H,), jnp.float32).at[H:2 * H].set(1.0)
    b_hh = jnp.zeros((4 * H,), jnp.float32).at[H:2 * H].set(1.0)
    w_lin = xavier_uniform(k3, (output_size, H))
    b_lin = jnp.zeros((output_size,), jnp.float32)
    return w_ih, w_hh, b_ih, b_hh, w_lin, b_lin


def reference_forward(x, h, c, w_ih, w_hh, b_ih, b_hh, w_lin, b_lin):
    """Pure-JAX reference of the same math, for a sanity check."""
    H = w_hh.shape[1]
    h2 = h.reshape(x.shape[0], H)
    c2 = c.reshape(x.shape[0], H)
    gates = x @ w_ih.T + b_ih + h2 @ w_hh.T + b_hh
    i = jax.nn.sigmoid(gates[:, :H])
    f = jax.nn.sigmoid(gates[:, H:2 * H])
    g = jnp.tanh(gates[:, 2 * H:3 * H])
    o = jax.nn.sigmoid(gates[:, 3 * H:])
    c_new = f * c2 + i * g
    h_new = o * jnp.tanh(c_new)
    out = h_new @ w_lin.T + b_lin
    return out, h_new, c_new


if __name__ == "__main__":
    input_size = 16
    hidden_size = 32
    batch_size = 2
    output_size = input_size  # module default (output_size=None -> input_size)

    key = jax.random.PRNGKey(0)
    kx, kp = jax.random.split(key)

    raw_params = init_params(kp, input_size, hidden_size, output_size)
    fused_params = prepare_params(*raw_params)    # one-time preprocessing

    x = jax.random.normal(kx, (batch_size, input_size), jnp.float32)
    # create_new_state(): zeros of shape (1, batch, hidden)
    h0 = jnp.zeros((1, batch_size, hidden_size), jnp.float32)
    c0 = jnp.zeros((1, batch_size, hidden_size), jnp.float32)

    o, (h1, c1) = lstm_forward(x, h0, c0, *fused_params)
    o = jax.block_until_ready(o)
    h1 = jax.block_until_ready(h1)
    c1 = jax.block_until_ready(c1)

    # correctness check against pure-JAX reference
    o_ref, h_ref, c_ref = reference_forward(x, h0, c0, *raw_params)
    np.testing.assert_allclose(np.asarray(o), np.asarray(o_ref), rtol=1e-5, atol=1e-5)
    np.testing.assert_allclose(np.asarray(h1[0]), np.asarray(h_ref), rtol=1e-5, atol=1e-5)
    np.testing.assert_allclose(np.asarray(c1[0]), np.asarray(c_ref), rtol=1e-5, atol=1e-5)

    assert o.shape == (batch_size, output_size)
    assert h1.shape == (1, batch_size, hidden_size)
    assert c1.shape == (1, batch_size, hidden_size)
    print("KERNEL_OK")
</pallas_src>

<mosaic_0001>
module attributes {stable_mosaic.version = 11 : i64} {
  func.func @lstm_step_kernel(%arg0: memref<2x48xf32, #tpu.memory_space<vmem>>, %arg1: memref<2x32xf32, #tpu.memory_space<vmem>>, %arg2: memref<48x128xf32, #tpu.memory_space<vmem>>, %arg3: memref<1x128xf32, #tpu.memory_space<vmem>>, %arg4: memref<32x16xf32, #tpu.memory_space<vmem>>, %arg5: memref<1x16xf32, #tpu.memory_space<vmem>>, %arg6: memref<2x16xf32, #tpu.memory_space<vmem>>, %arg7: memref<1x2x32xf32, #tpu.memory_space<vmem>>, %arg8: memref<1x2x32xf32, #tpu.memory_space<vmem>>) attributes {dimension_semantics = [], scalar_prefetch = 0 : i64, scratch_operands = 0 : i64, tpu.core_type = #tpu.core_type<tc>} {
    %c0 = arith.constant 0 : index
    %c0_0 = arith.constant 0 : index
    %0 = vector.load %arg0[%c0, %c0_0] : memref<2x48xf32, #tpu.memory_space<vmem>>, vector<2x48xf32>
    %c0_1 = arith.constant 0 : index
    %c0_2 = arith.constant 0 : index
    %1 = vector.load %arg1[%c0_1, %c0_2] : memref<2x32xf32, #tpu.memory_space<vmem>>, vector<2x32xf32>
    %c0_3 = arith.constant 0 : index
    %c0_4 = arith.constant 0 : index
    %2 = vector.load %arg2[%c0_3, %c0_4] : memref<48x128xf32, #tpu.memory_space<vmem>>, vector<48x128xf32>
    %cst = arith.constant dense<0.000000e+00> : vector<2x128xf32>
    %3 = tpu.matmul %0, %2, %cst {dimension_numbers = #tpu.dot_dimension_numbers<[1], [0], [0], [1], [0, 0, 1, 1], [], []>} : vector<2x48xf32>, vector<48x128xf32>, vector<2x128xf32> -> vector<2x128xf32>
    %c0_5 = arith.constant 0 : index
    %c0_6 = arith.constant 0 : index
    %4 = vector.load %arg3[%c0_5, %c0_6] : memref<1x128xf32, #tpu.memory_space<vmem>>, vector<1x128xf32>
    %5 = vector.broadcast %4 : vector<1x128xf32> to vector<2x128xf32>
    %6 = arith.addf %3, %5 : vector<2x128xf32>
    %7 = tpu.iota {dimensions = array<i32: 1>} : vector<2x128xi32>
    %c64_i32 = arith.constant 64 : i32
    %8 = vector.broadcast %c64_i32 : i32 to vector<2x128xi32>
    %9 = arith.cmpi sge, %7, %8 : vector<2x128xi32>
    %c96_i32 = arith.constant 96 : i32
    %10 = vector.broadcast %c96_i32 : i32 to vector<2x128xi32>
    %11 = arith.cmpi slt, %7, %10 : vector<2x128xi32>
    %12 = arith.andi %9, %11 : vector<2x128xi1>
    %cst_7 = arith.constant 5.000000e-01 : f32
    %13 = vector.broadcast %cst_7 : f32 to vector<2x128xf32>
    %14 = arith.mulf %13, %6 : vector<2x128xf32>
    %15 = arith.select %12, %6, %14 : vector<2x128xi1>, vector<2x128xf32>
    %16 = math.tanh %15 : vector<2x128xf32>
    %cst_8 = arith.constant 5.000000e-01 : f32
    %17 = vector.broadcast %cst_8 : f32 to vector<2x128xf32>
    %18 = arith.mulf %17, %16 : vector<2x128xf32>
    %cst_9 = arith.constant 5.000000e-01 : f32
    %19 = vector.broadcast %cst_9 : f32 to vector<2x128xf32>
    %20 = arith.addf %18, %19 : vector<2x128xf32>
    %21 = arith.select %12, %16, %20 : vector<2x128xi1>, vector<2x128xf32>
    %22 = vector.extract_strided_slice %21 {offsets = [0, 0], sizes = [2, 32], strides = [1, 1]} : vector<2x128xf32> to vector<2x32xf32>
    %23 = vector.extract_strided_slice %21 {offsets = [0, 32], sizes = [2, 32], strides = [1, 1]} : vector<2x128xf32> to vector<2x32xf32>
    %24 = vector.extract_strided_slice %21 {offsets = [0, 64], sizes = [2, 32], strides = [1, 1]} : vector<2x128xf32> to vector<2x32xf32>
    %25 = vector.extract_strided_slice %21 {offsets = [0, 96], sizes = [2, 32], strides = [1, 1]} : vector<2x128xf32> to vector<2x32xf32>
    %26 = arith.mulf %23, %1 : vector<2x32xf32>
    %27 = arith.mulf %22, %24 : vector<2x32xf32>
    %28 = arith.addf %26, %27 : vector<2x32xf32>
    %29 = math.tanh %28 : vector<2x32xf32>
    %30 = arith.mulf %25, %29 : vector<2x32xf32>
    %c0_10 = arith.constant 0 : index
    %c0_11 = arith.constant 0 : index
    %c0_12 = arith.constant 0 : index
    %31 = vector.load %arg8[%c0_10, %c0_11, %c0_12] : memref<1x2x32xf32, #tpu.memory_space<vmem>>, vector<1x2x32xf32>
    %32 = vector.shape_cast %31 : vector<1x2x32xf32> to vector<2x32xf32>
    %33 = vector.shape_cast %28 : vector<2x32xf32> to vector<1x2x32xf32>
    tpu.vector_store %arg8[%c0_10, %c0_11, %c0_12], %33 {strides = array<i32>} : memref<1x2x32xf32, #tpu.memory_space<vmem>>, vector<1x2x32xf32>,
    %c0_13 = arith.constant 0 : index
    %c0_14 = arith.constant 0 : index
    %c0_15 = arith.constant 0 : index
    %34 = vector.load %arg7[%c0_13, %c0_14, %c0_15] : memref<1x2x32xf32, #tpu.memory_space<vmem>>, vector<1x2x32xf32>
    %35 = vector.shape_cast %34 : vector<1x2x32xf32> to vector<2x32xf32>
    %36 = vector.shape_cast %30 : vector<2x32xf32> to vector<1x2x32xf32>
    tpu.vector_store %arg7[%c0_13, %c0_14, %c0_15], %36 {strides = array<i32>} : memref<1x2x32xf32, #tpu.memory_space<vmem>>, vector<1x2x32xf32>,
    %c0_16 = arith.constant 0 : index
    %c0_17 = arith.constant 0 : index
    %37 = vector.load %arg4[%c0_16, %c0_17] : memref<32x16xf32, #tpu.memory_space<vmem>>, vector<32x16xf32>
    %cst_18 = arith.constant dense<0.000000e+00> : vector<2x16xf32>
    %38 = tpu.matmul %30, %37, %cst_18 {dimension_numbers = #tpu.dot_dimension_numbers<[1], [0], [0], [1], [0, 0, 1, 1], [], []>} : vector<2x32xf32>, vector<32x16xf32>, vector<2x16xf32> -> vector<2x16xf32>
    %c0_19 = arith.constant 0 : index
    %c0_20 = arith.constant 0 : index
    %39 = vector.load %arg5[%c0_19, %c0_20] : memref<1x16xf32, #tpu.memory_space<vmem>>, vector<1x16xf32>
    %40 = vector.broadcast %39 : vector<1x16xf32> to vector<2x16xf32>
    %41 = arith.addf %38, %40 : vector<2x16xf32>
    %c0_21 = arith.constant 0 : index
    %c0_22 = arith.constant 0 : index
    %42 = vector.load %arg6[%c0_21, %c0_22] : memref<2x16xf32, #tpu.memory_space<vmem>>, vector<2x16xf32>
    tpu.vector_store %arg6[%c0_21, %c0_22], %41 {strides = array<i32>} : memref<2x16xf32, #tpu.memory_space<vmem>>, vector<2x16xf32>,
    return
  }
}

</mosaic_0001>

<bundles_post_ra>
// kernel: lstm_forward.1
= control target key start
LH: loop header
LB: loop body
LE: loop exit
PB: predicated region body
PF: predicated region fallthrough
CT: control target
= control target key end

     0   :  { %14 = vsyncpa [#allocation3], 0  ;;  %s381_s0 = inlined_call_operand.vmem [shape: f32[2,48], index: 0, kind: input, shape index: {}]   ;;  %s382_s1 = inlined_call_operand.vmem [shape: f32[2,32], index: 1, kind: input, shape index: {}]   ;;  %s383_s2 = inlined_call_operand.vmem [shape: f32[48,128], index: 2, kind: input, shape index: {}]   ;;  %s384_s3 = inlined_call_operand.vmem [shape: f32[1,128], index: 3, kind: input, shape index: {}]   ;;  %s385_s4 = inlined_call_operand.vmem [shape: f32[32,16], index: 4, kind: input, shape index: {}]   ;;  %s386_s5 = inlined_call_operand.vmem [shape: f32[1,16], index: 5, kind: input, shape index: {}]   ;;  %s387_s6 = inlined_call_operand.hbm [shape: f32[2,16], index: 6, kind: output, shape index: {0}]   ;;  %s388_s7 = inlined_call_operand.hbm [shape: f32[1,2,32], index: 7, kind: output, shape index: {1}]   ;;  %s389_s8 = inlined_call_operand.hbm [shape: f32[1,2,32], index: 8, kind: output, shape index: {2}]  }
   0x1   :  { %v35_v0 = vld [vmem:[%s383_s2 + $0x28] sm:$0xff]  ;;  %v34_v1 = vld [vmem:[%s383_s2 + $0x20] sm:$0xff]  ;;  %v33_v2 = vld [vmem:[%s383_s2 + $0x18] sm:$0xff] }
   0x2   :  { %54 = vmatpush.msra.mxu0 %v35_v0 }
   0x4   :  { %55 = vmatpush.msra.mxu0 %v34_v1 }
   0x5   :  { %15 = vsyncpa [#allocation5], 0  ;;  %v32_v3 = vld [vmem:[%s383_s2 + $0x10] sm:$0xff]  ;;  %v31_v4 = vld [vmem:[%s383_s2 + $0x8] sm:$0xff]  ;;  %vm40_vm0 = vcmask 392192   ;;  %v64_v7 = vlaneseq  ;;  %s278_s22 = smov 32  }
   0x6   :  { %56 = vmatpush.msra.mxu0 %v33_v2  ;;  %v30_v5 = vld [vmem:[%s383_s2] sm:$0xff]  ;;  %v110_v26 = vld [vmem:[%s385_s4 + $0x18] sm:$0xff]  ;;  %v109_v27 = vld [vmem:[%s385_s4 + $0x10] sm:$0xff]  ;;  %s279_s29 = smov 96   ;;  %vm115_vm4 = vcmask 261120   ;;  %vm100_vm5 = vcmask 254976  }
   0x7   :  { %v28_v6 = vld [vmem:[%s381_s0] sm:$0x3]  ;;  %v65_v8 = vand.u32 127, %v64_v7  ;;  %s277_s0 = smov 64   ;;  %130 = vmatpush.msra.mxu1 %v110_v26  ;;  %v108_v28 = vld [vmem:[%s385_s4 + $0x8] sm:$0xff]  ;;  %s280_s30 = smov [#allocation4]  }
   0x8   :  { %57 = vmatpush.msra.mxu0 %v32_v3  ;;  %v195_v9 = vld [vmem:[%s384_s3] ss:$0 sm:$0xff]  ;;  %s156_s9 = sshll.u32 %s280_s30, 4  ;;  %s158_s12 = sshll.u32 %s388_s7, 4  ;;  %vm138_vm6 = vcmask 123904   ;;  %s157_s9 = int_to_ptr.vmem [resolvable:$true] %s156_s9  ;;  %s159_s12 = int_to_ptr.hbm [resolvable:$true] %s158_s12 }
   0x9   :  { %vm66_vm1 = vcmp.ge.s32.totalorder %v65_v8, 64  ;;  %vm67_vm2 = vcmp.lt.s32.totalorder %v65_v8, 96  ;;  %v29_v18 = vld [vmem:[%s382_s1] sm:$0x3]  ;;  %131 = vmatpush.msra.mxu1 %v109_v27  ;;  %s169_s16 = sshll.u32 %s389_s8, 4  ;;  %s282_s18 = smov [#allocation2]   ;;  %s170_s16 = int_to_ptr.hbm [resolvable:$true] %s169_s16 }
   0xa   :  { %58 = vmatpush.msra.mxu0 %v31_v4  ;;  %vm68_vm3 = vmand %vm66_vm1, %vm67_vm2  ;;  %v107_v29 = vld [vmem:[%s385_s4] sm:$0xff]  ;;  %s281_s4 = smov [#allocation6]   ;;  %s145_s19 = sshll.u32 %s282_s18, 4  ;;  %s146_s19 = int_to_ptr.vmem [resolvable:$true] %s145_s19 }
   0xb   :  { %132 = vmatpush.msra.mxu1 %v108_v28  ;;  %s167_s13 = sshll.u32 %s281_s4, 4  ;;  %v196_v34 = vld [vmem:[%s386_s5] ss:$0 sm:$0xff]  ;;  %s147_s2 = sshll.u32 %s387_s6, 4  ;;  %s168_s13 = int_to_ptr.vmem [resolvable:$true] %s167_s13  ;;  %s148_s2 = int_to_ptr.hbm [resolvable:$true] %s147_s2 }
   0xc   :  { %59 = vmatpush.msra.mxu0 %v30_v5 }
   0xd   :  { %187 = vmatmul.msk.f32.vlgmr.msra.gmra.mxu0 %vm40_vm0, %v28_v6  ;;  %133 = vmatpush.msra.mxu1 %v107_v29 }
  0x8a   :  { %v61_v10 = vpop.f32.mrf.mxu0 }
  0x8b   :  { %v62_v11 = vadd.f32 %v195_v9, %v61_v10 }
  0x8d   :  { %v69_v12 = vmul.f32 0.5, %v62_v11 }
  0x8f   :  { %v70_v13 = vsel %vm68_vm3, %v62_v11, %v69_v12 }
  0x90   :  { %197 = vtanh.f32 %v70_v13 }
  0x96   :  { %v198_v14 = vpop.eup %197 }
  0x97   :  { %v72_v15 = vmul.f32 0.5, %v198_v14 }
  0x99   :  { %v73_v16 = vadd.f32 0.5, %v72_v15 }
  0x9b   :  { %v74_v17 = vsel %vm68_vm3, %v198_v14, %v73_v16 }
  0x9c   :  { %81 = vrot.lane.b32.xlu0 %v74_v17, %s277_s0 }
  0xa4   :  { %76 = vrot.lane.b32.xlu0 %v29_v18, %s278_s22 }
 0x10e   :  { %v82_v19 = vpop.permute.xlu0 %81 }
 0x10f   :  { %v84_v20 = vmul.f32 %v82_v19, %v74_v17 }
 0x111   :  { %86 = vrot.lane.b32.xlu1 %v84_v20, %s278_s22 }
 0x116   :  { %v77_v21 = vpop.permute.xlu0 %76 }
 0x117   :  { %v79_v22 = vmul.f32 %v77_v21, %v74_v17 }
 0x183   :  { %v87_v23 = vpop.permute.xlu1 %86 }
 0x184   :  { %v89_v24 = vadd.f32 %v87_v23, %v79_v22 }
 0x186   :  { %199 = vtanh.f32 %v89_v24 }
 0x18c   :  { %v200_v25 = vpop.eup %199 }
 0x18d   :  { %92 = vrot.lane.b32.xlu1 %v200_v25, %s277_s0 }
 0x1ff   :  { %v93_v30 = vpop.permute.xlu1 %92 }
 0x200   :  { %v95_v31 = vmul.f32 %v93_v30, %v74_v17 }
 0x202   :  { %103 = vrot.lane.b32.xlu2 %v95_v31, %s278_s22 }
 0x20a   :  { %97 = vrot.lane.b32.xlu2 %v89_v24, %s279_s29 }
 0x25c   :  { %v104_v32 = vpop.permute.xlu2 %103 }
 0x25d   :  { %188 = vmatmul.msk.f32.vlgmr.msra.gmra.mxu1 %vm115_vm4, %v104_v32  ;;  %106 = vst.msk [vmem:[#allocation4] sm:$0x3] %vm100_vm5, %v104_v32 }
 0x25e   :  { %161 = dma.vmem_to_hbm [thread:$0]  %s157_s9, 32, %s159_s12, [#allocation5]  }
 0x264   :  { %v98_v33 = vpop.permute.xlu2 %97 }
 0x265   :  { %101 = vst.msk [vmem:[#allocation6] sm:$0x3] %vm100_vm5, %v98_v33 }
 0x266   :  { %172 = dma.vmem_to_hbm [thread:$0]  %s168_s13, 32, %s170_s16, [#allocation5]  }
 0x2da   :  { %v135_v35 = vpop.f32.mrf.mxu1 }
 0x2db   :  { %v136_v36 = vadd.f32 %v196_v34, %v135_v35 }
 0x2dd   :  { %139 = vst.msk [vmem:[#allocation2] sm:$0x3] %vm138_vm6, %v136_v36 }
 0x2de   :  { %150 = dma.vmem_to_hbm [thread:$0]  %s146_s19, 32, %s148_s2, [#allocation3]  }
 0x2df   :  { %273 = dma.done.wait [#allocation3], 32  }
 0x2e0   :  { %274 = vsyncadd [#allocation3], 4294967264 }
 0x2e1   :  { %275 = dma.done.wait [#allocation5], 64  }
 0x2e2   :  { %276 = vsyncadd [#allocation5], 4294967232 }
 0x2e3   :  { %185 = vsyncpa [#allocation3], 1 }
 0x2e4   :  { %186 = vsyncpa [#allocation5], 1 }

</bundles_post_ra>
